<compile_context>
chip_gen: v7x
topology: tpu7x:2x2x1
jax: 0.10.0
libtpu: 0.0.40
codegen_flags: <defaults>
</compile_context>

<pallas_src>
import functools

import jax
import jax.numpy as jnp
import numpy as np
from jax.experimental import pallas as pl
from jax.experimental.pallas import tpu as pltpu

EPS = 1e-6
LANE = 128
SUBLANE = 8


def attention_pallas(x, params, *, tn_max=512):
    """x: (B, C, H, W) f32.  params: (wq, bq, wk, bk, wv, bv, gamma)."""
    wq, bq, wk, bk, wv, bv, gamma = params
    B, C, H, W = x.shape
    N = H * W
    Cq = wq.shape[0]

    # --- pad Cq up to a full sublane (exact: padded rows are all-zero) -------
    CQP = ((Cq + SUBLANE - 1) // SUBLANE) * SUBLANE

    def pad_rows(a, rows):
        return jnp.pad(a, ((0, rows - a.shape[0]), (0, 0)))

    wq_p = pad_rows(wq, CQP)
    bq_p = pad_rows(bq, CQP)
    wk_p = pad_rows(wk, CQP)
    bk_p = pad_rows(bk, CQP)

    # --- fuse the K and V 1x1-conv projections into a single matmul ---------
    wkv = jnp.concatenate([wk_p, wv], axis=0)        # (CQP + C, C)
    bkv = jnp.concatenate([bk_p, bv], axis=0)        # (CQP + C, 1)
    CKV = CQP + C

    # --- lane-pad N and pick the N tile size ---------------------------------
    n_lane = ((N + LANE - 1) // LANE) * LANE
    tn = LANE
    for cand in (tn_max, 384, 256, 128):
        if cand % LANE == 0 and n_lane % cand == 0:
            tn = cand
            break
    n_pad = n_lane
    T = n_pad // tn
    needs_mask = (n_pad != N)
    n_f = float(N)

    xf = x.reshape(B, C, N)
    if n_pad != N:
        xf = jnp.pad(xf, ((0, 0), (0, 0), (0, n_pad - N)))
    # bf16 inputs for the MXU / half the HBM traffic; accumulate in f32.
    xf = xf.astype(jnp.bfloat16)
    wkv_b = wkv.astype(jnp.bfloat16)
    wq_b = wq_p.astype(jnp.bfloat16)

    def kernel(x_ref, wkv_ref, bkv_ref, wq_ref, bq_ref, gamma_ref, o_ref,
               ksum_ref, vsum_ref, mat_ref):
        p = pl.program_id(1)          # 0 = reduction pass, 1 = output pass
        t = pl.program_id(2)          # N-tile index
        x_t = x_ref[...]              # (C, tn) bf16

        @pl.when(p == 0)
        def _reduce():
            @pl.when(t == 0)
            def _init():
                ksum_ref[...] = jnp.zeros_like(ksum_ref)
                vsum_ref[...] = jnp.zeros_like(vsum_ref)
                mat_ref[...] = jnp.zeros_like(mat_ref)

            # fused K/V projection: one MXU push instead of two skinny ones.
            kv = jnp.dot(wkv_ref[...], x_t,
                         preferred_element_type=jnp.float32) + bkv_ref[...]
            k = kv[:CQP, :]                              # (CQP, tn)
            v = kv[CQP:, :]                              # (C,   tn)
            # l2 norm over the channel axis (EUP rsqrt).
            k = k * jax.lax.rsqrt(jnp.sum(k * k, axis=0, keepdims=True))
            if needs_mask:
                col = t * tn + jax.lax.broadcasted_iota(jnp.int32, (1, tn), 1)
                valid = col < N
                k = jnp.where(valid, k, 0.0)
                v = jnp.where(valid, v, 0.0)
            ksum_ref[...] += jnp.sum(k, axis=1, keepdims=True)       # (CQP, 1)
            vsum_ref[...] += jnp.sum(v, axis=1, keepdims=True)       # (C, 1)
            # V K^T without any explicit transpose (contract the N axis).
            mat_ref[...] += jax.lax.dot_general(
                v, k, (((1,), (1,)), ((), ())),
                preferred_element_type=jnp.float32)                  # (C, CQP)

        @pl.when(p == 1)
        def _emit():
            q = jnp.dot(wq_ref[...], x_t,
                        preferred_element_type=jnp.float32) + bq_ref[...]
            q = q * jax.lax.rsqrt(jnp.sum(q * q, axis=0, keepdims=True))
            # tailor = 1 / (N + Q^T (k_sum + eps))
            denom = n_f + jnp.sum(q * (ksum_ref[...] + EPS),
                                  axis=0, keepdims=True)             # (1, tn)
            tailor = pl.reciprocal(denom, approx=True)
            ms = vsum_ref[...] + jnp.dot(mat_ref[...], q,
                                         preferred_element_type=jnp.float32)
            o_ref[...] = gamma_ref[0, 0] * ms * tailor               # (C, tn)

    out = pl.pallas_call(
        kernel,
        out_shape=jax.ShapeDtypeStruct((B, C, n_pad), jnp.float32),
        grid_spec=pltpu.PrefetchScalarGridSpec(
            num_scalar_prefetch=0,
            grid=(B, 2, T),
            in_specs=[
                pl.BlockSpec((pl.Squeezed(), C, tn), lambda b, p, t: (b, 0, t)),
                pl.BlockSpec((CKV, C), lambda b, p, t: (0, 0)),    # fused Wkv
                pl.BlockSpec((CKV, 1), lambda b, p, t: (0, 0)),    # fused bkv
                pl.BlockSpec((CQP, C), lambda b, p, t: (0, 0)),    # Wq (padded)
                pl.BlockSpec((CQP, 1), lambda b, p, t: (0, 0)),    # bq (padded)
                pl.BlockSpec(memory_space=pltpu.MemorySpace.SMEM),  # gamma
            ],
            # Phase 0 parks on output block (b,0,0) and never writes it; phase 1
            # writes every tile exactly once -> no wasted / masked stores.
            out_specs=pl.BlockSpec((pl.Squeezed(), C, tn),
                                   lambda b, p, t: (b, 0, p * t)),
            scratch_shapes=[
                pltpu.VMEM((CQP, 1), jnp.float32),   # k_sum accumulator
                pltpu.VMEM((C, 1), jnp.float32),     # v_sum accumulator
                pltpu.VMEM((C, CQP), jnp.float32),   # V K^T accumulator
            ],
        ),
        compiler_params=pltpu.CompilerParams(
            dimension_semantics=("parallel", "arbitrary", "arbitrary")),
    )(xf, wkv_b, bkv, wq_b, bq_p, gamma)

    return out[:, :, :N].reshape(B, C, H, W)


def attention_ref(x, params):
    # Pure-JAX reference following the torch einsums exactly (f32 throughout).
    wq, bq, wk, bk, wv, bv, gamma = params
    B, C, H, W = x.shape
    N = H * W
    xf = x.reshape(B, C, N)
    Q = jnp.einsum('oc,bcn->bon', wq, xf) + bq[None]
    K = jnp.einsum('oc,bcn->bon', wk, xf) + bk[None]
    V = jnp.einsum('oc,bcn->bon', wv, xf) + bv[None]

    def l2n(t):
        return t / jnp.linalg.norm(t, axis=-2, keepdims=True)

    Qn = l2n(Q).transpose(0, 2, 1)                                   # (B, N, Cq)
    Kn = l2n(K)                                                      # (B, Cq, N)
    tailor = 1.0 / (N + jnp.einsum('bnc,bc->bn', Qn,
                                   jnp.sum(Kn, axis=-1) + EPS))      # (B, N)
    vsum = jnp.sum(V, axis=-1)[:, :, None]                           # (B, C, 1)
    matrix = jnp.einsum('bmn,bcn->bmc', Kn, V)                       # (B, Cq, C)
    ms = vsum + jnp.einsum('bnm,bmc->bcn', Qn, matrix)               # (B, C, N)
    wval = ms * tailor[:, None, :]
    return gamma[0, 0] * wval.reshape(B, C, H, W)


if __name__ == "__main__":
    key = jax.random.PRNGKey(0)
    # in_places=32, scale=8 -> Cq=4; 30x30 spatial exercises the N lane-padding
    # mask and the multi-tile (tn=512, T=2) two-pass path.
    B, C, H, W = 2, 32, 30, 30
    scale = 8
    Cq = C // scale
    ks = jax.random.split(key, 7)

    x = jax.random.normal(ks[0], (B, C, H, W), jnp.float32)
    wq = 0.1 * jax.random.normal(ks[1], (Cq, C), jnp.float32)
    bq = 0.1 * jax.random.normal(ks[2], (Cq, 1), jnp.float32)
    wk = 0.1 * jax.random.normal(ks[3], (Cq, C), jnp.float32)
    bk = 0.1 * jax.random.normal(ks[4], (Cq, 1), jnp.float32)
    wv = 0.1 * jax.random.normal(ks[5], (C, C), jnp.float32)
    bv = 0.1 * jax.random.normal(ks[6], (C, 1), jnp.float32)
    # nn.Parameter(torch.zeros(1)) -> gamma defaults to 0 (output would be all
    # zeros); use a deterministic nonzero value so the compute path is exercised.
    gamma = jnp.full((1, 1), 0.5, jnp.float32)

    params = (wq, bq, wk, bk, wv, bv, gamma)

    out = attention_pallas(x, params)
    jax.block_until_ready(out)

    ref = attention_ref(x, params)
    # Tolerance accounts for bf16 matmul inputs + approx reciprocal.
    np.testing.assert_allclose(np.asarray(out), np.asarray(ref),
                               rtol=2e-2, atol=2e-3)
    print("KERNEL_OK")
</pallas_src>

<mosaic_0001>
module attributes {stable_mosaic.version = 11 : i64} {
  func.func @kernel(%arg0: i32, %arg1: i32, %arg2: i32, %arg3: memref<1x32x512xbf16, #tpu.memory_space<vmem>>, %arg4: memref<40x32xbf16, #tpu.memory_space<vmem>>, %arg5: memref<40x1xf32, #tpu.memory_space<vmem>>, %arg6: memref<8x32xbf16, #tpu.memory_space<vmem>>, %arg7: memref<8x1xf32, #tpu.memory_space<vmem>>, %arg8: memref<1x1xf32, #tpu.memory_space<smem>>, %arg9: memref<1x32x512xf32, #tpu.memory_space<vmem>>, %arg10: memref<8x1xf32, #tpu.memory_space<vmem>>, %arg11: memref<32x1xf32, #tpu.memory_space<vmem>>, %arg12: memref<32x8xf32, #tpu.memory_space<vmem>>) attributes {dimension_semantics = [#tpu.dimension_semantics<parallel>, #tpu.dimension_semantics<arbitrary>, #tpu.dimension_semantics<arbitrary>], iteration_bounds = array<i64: 2, 2, 2>, scalar_prefetch = 0 : i64, scratch_operands = 3 : i64, tpu.core_type = #tpu.core_type<tc>, window_params = [{transform_indices = @transform_0, window_bounds = array<i64: 1, 32, 512>}, {pipeline_mode = #tpu.pipeline_mode<synchronous>, transform_indices = @transform_1, window_bounds = array<i64: 40, 32>}, {pipeline_mode = #tpu.pipeline_mode<synchronous>, transform_indices = @transform_2, window_bounds = array<i64: 40, 1>}, {pipeline_mode = #tpu.pipeline_mode<synchronous>, transform_indices = @transform_3, window_bounds = array<i64: 8, 32>}, {pipeline_mode = #tpu.pipeline_mode<synchronous>, transform_indices = @transform_4, window_bounds = array<i64: 8, 1>}, {transform_indices = @transform_5, window_bounds = array<i64: 1, 1>}, {transform_indices = @transform_6, window_bounds = array<i64: 1, 32, 512>}]} {
    %c0 = arith.constant 0 : index
    %c0_0 = arith.constant 0 : index
    %c0_1 = arith.constant 0 : index
    %0 = vector.load %arg3[%c0, %c0_0, %c0_1] : memref<1x32x512xbf16, #tpu.memory_space<vmem>>, vector<1x32x512xbf16>
    %1 = vector.shape_cast %0 : vector<1x32x512xbf16> to vector<32x512xbf16>
    %c0_i32 = arith.constant 0 : i32
    %2 = arith.cmpi eq, %arg1, %c0_i32 : i32
    %3 = arith.extui %2 : i1 to i32
    %c0_i32_2 = arith.constant 0 : i32
    %4 = arith.cmpi ne, %3, %c0_i32_2 : i32
    scf.if %4 {
      %c0_i32_4 = arith.constant 0 : i32
      %8 = arith.cmpi eq, %arg2, %c0_i32_4 : i32
      %9 = arith.extui %8 : i1 to i32
      %c0_i32_5 = arith.constant 0 : i32
      %10 = arith.cmpi ne, %9, %c0_i32_5 : i32
      scf.if %10 {
        %cst_28 = arith.constant 0.000000e+00 : f32
        %52 = vector.broadcast %cst_28 : f32 to vector<8x1xf32>
        %c0_29 = arith.constant 0 : index
        %c0_30 = arith.constant 0 : index
        %53 = vector.load %arg10[%c0_29, %c0_30] : memref<8x1xf32, #tpu.memory_space<vmem>>, vector<8x1xf32>
        tpu.vector_store %arg10[%c0_29, %c0_30], %52 {strides = array<i32>} : memref<8x1xf32, #tpu.memory_space<vmem>>, vector<8x1xf32>,
        %cst_31 = arith.constant 0.000000e+00 : f32
        %54 = vector.broadcast %cst_31 : f32 to vector<32x1xf32>
        %c0_32 = arith.constant 0 : index
        %c0_33 = arith.constant 0 : index
        %55 = vector.load %arg11[%c0_32, %c0_33] : memref<32x1xf32, #tpu.memory_space<vmem>>, vector<32x1xf32>
        tpu.vector_store %arg11[%c0_32, %c0_33], %54 {strides = array<i32>} : memref<32x1xf32, #tpu.memory_space<vmem>>, vector<32x1xf32>,
        %cst_34 = arith.constant 0.000000e+00 : f32
        %56 = vector.broadcast %cst_34 : f32 to vector<32x8xf32>
        %c0_35 = arith.constant 0 : index
        %c0_36 = arith.constant 0 : index
        %57 = vector.load %arg12[%c0_35, %c0_36] : memref<32x8xf32, #tpu.memory_space<vmem>>, vector<32x8xf32>
        tpu.vector_store %arg12[%c0_35, %c0_36], %56 {strides = array<i32>} : memref<32x8xf32, #tpu.memory_space<vmem>>, vector<32x8xf32>,
      } else {
      }
      %c0_6 = arith.constant 0 : index
      %c0_7 = arith.constant 0 : index
      %11 = vector.load %arg4[%c0_6, %c0_7] : memref<40x32xbf16, #tpu.memory_space<vmem>>, vector<40x32xbf16>
      %cst = arith.constant dense<0.000000e+00> : vector<40x512xf32>
      %12 = tpu.matmul %11, %1, %cst {dimension_numbers = #tpu.dot_dimension_numbers<[1], [0], [0], [1], [0, 0, 1, 1], [], []>} : vector<40x32xbf16>, vector<32x512xbf16>, vector<40x512xf32> -> vector<40x512xf32>
      %c0_8 = arith.constant 0 : index
      %c0_9 = arith.constant 0 : index
      %13 = vector.load %arg5[%c0_8, %c0_9] : memref<40x1xf32, #tpu.memory_space<vmem>>, vector<40x1xf32>
      %14 = vector.broadcast %13 : vector<40x1xf32> to vector<40x512xf32>
      %15 = arith.addf %12, %14 : vector<40x512xf32>
      %16 = vector.extract_strided_slice %15 {offsets = [0, 0], sizes = [8, 512], strides = [1, 1]} : vector<40x512xf32> to vector<8x512xf32>
      %17 = vector.extract_strided_slice %15 {offsets = [8, 0], sizes = [32, 512], strides = [1, 1]} : vector<40x512xf32> to vector<32x512xf32>
      %18 = arith.mulf %16, %16 : vector<8x512xf32>
      %cst_10 = arith.constant dense<0.000000e+00> : vector<512xf32>
      %19 = vector.multi_reduction <add>, %18, %cst_10 [0] : vector<8x512xf32> to vector<512xf32>
      %20 = vector.shape_cast %19 : vector<512xf32> to vector<1x512xf32>
      %21 = math.rsqrt %20 : vector<1x512xf32>
      %22 = vector.broadcast %21 : vector<1x512xf32> to vector<8x512xf32>
      %23 = arith.mulf %16, %22 : vector<8x512xf32>
      %c512_i32 = arith.constant 512 : i32
      %24 = arith.muli %arg2, %c512_i32 : i32
      %25 = tpu.iota {dimensions = array<i32: 1>} : vector<1x512xi32>
      %26 = vector.broadcast %24 : i32 to vector<1x512xi32>
      %27 = arith.addi %26, %25 : vector<1x512xi32>
      %c900_i32 = arith.constant 900 : i32
      %28 = vector.broadcast %c900_i32 : i32 to vector<1x512xi32>
      %29 = arith.cmpi slt, %27, %28 : vector<1x512xi32>
      %cst_11 = arith.constant 0.000000e+00 : f32
      %30 = vector.shape_cast %29 : vector<1x512xi1> to vector<1x512xi1>
      %31 = vector.broadcast %30 : vector<1x512xi1> to vector<8x512xi1>
      %32 = vector.broadcast %cst_11 : f32 to vector<8x512xf32>
      %33 = arith.select %31, %23, %32 : vector<8x512xi1>, vector<8x512xf32>
      %cst_12 = arith.constant 0.000000e+00 : f32
      %34 = vector.shape_cast %29 : vector<1x512xi1> to vector<1x512xi1>
      %35 = vector.broadcast %34 : vector<1x512xi1> to vector<32x512xi1>
      %36 = vector.broadcast %cst_12 : f32 to vector<32x512xf32>
      %37 = arith.select %35, %17, %36 : vector<32x512xi1>, vector<32x512xf32>
      %c0_13 = arith.constant 0 : index
      %c0_14 = arith.constant 0 : index
      %38 = vector.load %arg10[%c0_13, %c0_14] : memref<8x1xf32, #tpu.memory_space<vmem>>, vector<8x1xf32>
      %cst_15 = arith.constant dense<0.000000e+00> : vector<8xf32>
      %39 = vector.multi_reduction <add>, %33, %cst_15 [1] : vector<8x512xf32> to vector<8xf32>
      %40 = vector.shape_cast %39 : vector<8xf32> to vector<8x1xf32>
      %41 = arith.addf %38, %40 : vector<8x1xf32>
      %c0_16 = arith.constant 0 : index
      %c0_17 = arith.constant 0 : index
      %42 = vector.load %arg10[%c0_16, %c0_17] : memref<8x1xf32, #tpu.memory_space<vmem>>, vector<8x1xf32>
      tpu.vector_store %arg10[%c0_16, %c0_17], %41 {strides = array<i32>} : memref<8x1xf32, #tpu.memory_space<vmem>>, vector<8x1xf32>,
      %c0_18 = arith.constant 0 : index
      %c0_19 = arith.constant 0 : index
      %43 = vector.load %arg11[%c0_18, %c0_19] : memref<32x1xf32, #tpu.memory_space<vmem>>, vector<32x1xf32>
      %cst_20 = arith.constant dense<0.000000e+00> : vector<32xf32>
      %44 = vector.multi_reduction <add>, %37, %cst_20 [1] : vector<32x512xf32> to vector<32xf32>
      %45 = vector.shape_cast %44 : vector<32xf32> to vector<32x1xf32>
      %46 = arith.addf %43, %45 : vector<32x1xf32>
      %c0_21 = arith.constant 0 : index
      %c0_22 = arith.constant 0 : index
      %47 = vector.load %arg11[%c0_21, %c0_22] : memref<32x1xf32, #tpu.memory_space<vmem>>, vector<32x1xf32>
      tpu.vector_store %arg11[%c0_21, %c0_22], %46 {strides = array<i32>} : memref<32x1xf32, #tpu.memory_space<vmem>>, vector<32x1xf32>,
      %c0_23 = arith.constant 0 : index
      %c0_24 = arith.constant 0 : index
      %48 = vector.load %arg12[%c0_23, %c0_24] : memref<32x8xf32, #tpu.memory_space<vmem>>, vector<32x8xf32>
      %cst_25 = arith.constant dense<0.000000e+00> : vector<32x8xf32>
      %49 = tpu.matmul %37, %33, %cst_25 {dimension_numbers = #tpu.dot_dimension_numbers<[1], [1], [0], [0], [0, 0, 1, 0], [], []>} : vector<32x512xf32>, vector<8x512xf32>, vector<32x8xf32> -> vector<32x8xf32>
      %50 = arith.addf %48, %49 : vector<32x8xf32>
      %c0_26 = arith.constant 0 : index
      %c0_27 = arith.constant 0 : index
      %51 = vector.load %arg12[%c0_26, %c0_27] : memref<32x8xf32, #tpu.memory_space<vmem>>, vector<32x8xf32>
      tpu.vector_store %arg12[%c0_26, %c0_27], %50 {strides = array<i32>} : memref<32x8xf32, #tpu.memory_space<vmem>>, vector<32x8xf32>,
    } else {
    }
    %c1_i32 = arith.constant 1 : i32
    %5 = arith.cmpi eq, %arg1, %c1_i32 : i32
    %6 = arith.extui %5 : i1 to i32
    %c0_i32_3 = arith.constant 0 : i32
    %7 = arith.cmpi ne, %6, %c0_i32_3 : i32
    scf.if %7 {
      %c0_4 = arith.constant 0 : index
      %c0_5 = arith.constant 0 : index
      %8 = vector.load %arg6[%c0_4, %c0_5] : memref<8x32xbf16, #tpu.memory_space<vmem>>, vector<8x32xbf16>
      %cst = arith.constant dense<0.000000e+00> : vector<8x512xf32>
      %9 = tpu.matmul %8, %1, %cst {dimension_numbers = #tpu.dot_dimension_numbers<[1], [0], [0], [1], [0, 0, 1, 1], [], []>} : vector<8x32xbf16>, vector<32x512xbf16>, vector<8x512xf32> -> vector<8x512xf32>
      %c0_6 = arith.constant 0 : index
      %c0_7 = arith.constant 0 : index
      %10 = vector.load %arg7[%c0_6, %c0_7] : memref<8x1xf32, #tpu.memory_space<vmem>>, vector<8x1xf32>
      %11 = vector.broadcast %10 : vector<8x1xf32> to vector<8x512xf32>
      %12 = arith.addf %9, %11 : vector<8x512xf32>
      %13 = arith.mulf %12, %12 : vector<8x512xf32>
      %cst_8 = arith.constant dense<0.000000e+00> : vector<512xf32>
      %14 = vector.multi_reduction <add>, %13, %cst_8 [0] : vector<8x512xf32> to vector<512xf32>
      %15 = vector.shape_cast %14 : vector<512xf32> to vector<1x512xf32>
      %16 = math.rsqrt %15 : vector<1x512xf32>
      %17 = vector.broadcast %16 : vector<1x512xf32> to vector<8x512xf32>
      %18 = arith.mulf %12, %17 : vector<8x512xf32>
      %c0_9 = arith.constant 0 : index
      %c0_10 = arith.constant 0 : index
      %19 = vector.load %arg10[%c0_9, %c0_10] : memref<8x1xf32, #tpu.memory_space<vmem>>, vector<8x1xf32>
      %cst_11 = arith.constant 9.99999997E-7 : f32
      %20 = vector.broadcast %cst_11 : f32 to vector<8x1xf32>
      %21 = arith.addf %19, %20 : vector<8x1xf32>
      %22 = vector.broadcast %21 : vector<8x1xf32> to vector<8x512xf32>
      %23 = arith.mulf %18, %22 : vector<8x512xf32>
      %cst_12 = arith.constant dense<0.000000e+00> : vector<512xf32>
      %24 = vector.multi_reduction <add>, %23, %cst_12 [0] : vector<8x512xf32> to vector<512xf32>
      %25 = vector.shape_cast %24 : vector<512xf32> to vector<1x512xf32>
      %cst_13 = arith.constant 9.000000e+02 : f32
      %26 = vector.broadcast %cst_13 : f32 to vector<1x512xf32>
      %27 = arith.addf %26, %25 : vector<1x512xf32>
      %28 = tpu.reciprocal %27 {approx = true} : vector<1x512xf32> -> vector<1x512xf32>
      %c0_14 = arith.constant 0 : index
      %c0_15 = arith.constant 0 : index
      %29 = vector.load %arg11[%c0_14, %c0_15] : memref<32x1xf32, #tpu.memory_space<vmem>>, vector<32x1xf32>
      %c0_16 = arith.constant 0 : index
      %c0_17 = arith.constant 0 : index
      %30 = vector.load %arg12[%c0_16, %c0_17] : memref<32x8xf32, #tpu.memory_space<vmem>>, vector<32x8xf32>
      %cst_18 = arith.constant dense<0.000000e+00> : vector<32x512xf32>
      %31 = tpu.matmul %30, %18, %cst_18 {dimension_numbers = #tpu.dot_dimension_numbers<[1], [0], [0], [1], [0, 0, 1, 1], [], []>} : vector<32x8xf32>, vector<8x512xf32>, vector<32x512xf32> -> vector<32x512xf32>
      %32 = vector.broadcast %29 : vector<32x1xf32> to vector<32x512xf32>
      %33 = arith.addf %32, %31 : vector<32x512xf32>
      %c0_19 = arith.constant 0 : index
      %c0_20 = arith.constant 0 : index
      %34 = memref.load %arg8[%c0_19, %c0_20] : memref<1x1xf32, #tpu.memory_space<smem>>
      %35 = vector.broadcast %34 : f32 to vector<32x512xf32>
      %36 = arith.mulf %35, %33 : vector<32x512xf32>
      %37 = vector.broadcast %28 : vector<1x512xf32> to vector<32x512xf32>
      %38 = arith.mulf %36, %37 : vector<32x512xf32>
      %c0_21 = arith.constant 0 : index
      %c0_22 = arith.constant 0 : index
      %c0_23 = arith.constant 0 : index
      %39 = vector.load %arg9[%c0_21, %c0_22, %c0_23] : memref<1x32x512xf32, #tpu.memory_space<vmem>>, vector<1x32x512xf32>
      %40 = vector.shape_cast %39 : vector<1x32x512xf32> to vector<32x512xf32>
      %41 = vector.shape_cast %38 : vector<32x512xf32> to vector<1x32x512xf32>
      tpu.vector_store %arg9[%c0_21, %c0_22, %c0_23], %41 {strides = array<i32>} : memref<1x32x512xf32, #tpu.memory_space<vmem>>, vector<1x32x512xf32>,
    } else {
    }
    return
  }
  func.func @transform_0(%arg0: i32, %arg1: i32, %arg2: i32) -> (i32, i32, i32) {
    %c0_i32 = arith.constant 0 : i32
    %c0_i32_0 = arith.constant 0 : i32
    return %arg0, %c0_i32, %arg2 : i32, i32, i32
  }
  func.func @transform_1(%arg0: i32, %arg1: i32, %arg2: i32) -> (i32, i32) {
    %c0_i32 = arith.constant 0 : i32
    %c0_i32_0 = arith.constant 0 : i32
    %c0_i32_1 = arith.constant 0 : i32
    return %c0_i32, %c0_i32_0 : i32, i32
  }
  func.func @transform_2(%arg0: i32, %arg1: i32, %arg2: i32) -> (i32, i32) {
    %c0_i32 = arith.constant 0 : i32
    %c0_i32_0 = arith.constant 0 : i32
    %c0_i32_1 = arith.constant 0 : i32
    return %c0_i32, %c0_i32_0 : i32, i32
  }
  func.func @transform_3(%arg0: i32, %arg1: i32, %arg2: i32) -> (i32, i32) {
    %c0_i32 = arith.constant 0 : i32
    %c0_i32_0 = arith.constant 0 : i32
    %c0_i32_1 = arith.constant 0 : i32
    return %c0_i32, %c0_i32_0 : i32, i32
  }
  func.func @transform_4(%arg0: i32, %arg1: i32, %arg2: i32) -> (i32, i32) {
    %c0_i32 = arith.constant 0 : i32
    %c0_i32_0 = arith.constant 0 : i32
    %c0_i32_1 = arith.constant 0 : i32
    return %c0_i32, %c0_i32_0 : i32, i32
  }
  func.func @transform_5(%arg0: i32, %arg1: i32, %arg2: i32) -> (i32, i32) {
    %c0_i32 = arith.constant 0 : i32
    %c0_i32_0 = arith.constant 0 : i32
    %c0_i32_1 = arith.constant 0 : i32
    return %c0_i32, %c0_i32_0 : i32, i32
  }
  func.func @transform_6(%arg0: i32, %arg1: i32, %arg2: i32) -> (i32, i32, i32) {
    %0 = arith.muli %arg1, %arg2 : i32
    %c0_i32 = arith.constant 0 : i32
    %c0_i32_0 = arith.constant 0 : i32
    return %arg0, %c0_i32, %0 : i32, i32, i32
  }
}

</mosaic_0001>

<bundles_post_ra>
// kernel: tpu_custom_call.1
= control target key start
LH: loop header
LB: loop body
LE: loop exit
PB: predicated region body
PF: predicated region fallthrough
CT: control target
= control target key end

     0   :  { %s2503_s0 = inlined_call_operand.hbm [shape: bf16[2,32,1024], index: 0, kind: input, shape index: {}]   ;;  %s2504_s1 = inlined_call_operand.vmem [shape: bf16[40,32], index: 1, kind: input, shape index: {}]   ;;  %s2505_s2 = inlined_call_operand.vmem [shape: f32[40,1], index: 2, kind: input, shape index: {}]   ;;  %s2506_s3 = inlined_call_operand.vmem [shape: bf16[8,32], index: 3, kind: input, shape index: {}]   ;;  %s2507_s4 = inlined_call_operand.vmem [shape: f32[8,1], index: 4, kind: input, shape index: {}]   ;;  %s2508_s5 = inlined_call_operand.<no memory space> [shape: f32[1,1], index: 5, kind: input, shape index: {}]   ;;  %s2509_s6 = inlined_call_operand.hbm [shape: f32[2,32,1024], index: 6, kind: output, shape index: {}]  }
   0x1   :  { %2517 = sst [smem:[#allocation19_spill]] %s2503_s0 }
   0x2   :  { %2518 = sst [smem:[#allocation20_spill]] %s2509_s6 }
   0x3   :  { %11 = sst [smem:[#allocation5]] %s2508_s5 }
   0x4   :  { %12 = vsyncpa [#allocation7], 0 }
   0x5   :  { %14 = vsyncpa [#allocation7 + $0x1], 0 }
   0x6   :  { %15 = vsyncpa [#allocation8], 0 }
   0x7   :  { %17 = vsyncpa [#allocation8 + $0x1], 0  ;;  %s1921_s23 = smov 0   ;;  %s1923_s24 = smov 0  }
   0x8   :  { %s1925_s25 = smov 0   ;;  %s1927_s26 = smov 0  }
   0x9   :  { %s1929_s27 = smov 0   ;;  %s1931_s28 = smov 0  }
   0xa   :  { %s1933_s29 = smov 0   ;;  %s1935_s30 = smov 0  }
   0xb   :  { %s1937_s5 = smov 0   ;;  %s1939_s7 = smov 0  }
   0xc   :  { %s1941_s8 = smov 0   ;;  %s1943_s9 = smov 0  }
   0xd   :  { %s1945_s10 = smov 0  }
   0xe LB: > { %2519 = sst [smem:[#allocation12_spill]] %s1841_s28  ;;  %s1466_s11 = sadd.s32 4294967295, %s1869_s10   ;;  %s1869_s10 = sphi %s1945_s10, %s23_s10   ;;  %s1865_s9 = sphi %s1943_s9, %s2556_s9   ;;  %s1861_s8 = sphi %s1941_s8, %s2544_s8   ;;  %s1857_s7 = sphi %s1939_s7, %s2555_s7   ;;  %s1853_s5 = sphi %s1937_s5, %s2554_s5   ;;  %s1849_s30 = sphi %s1935_s30, %s2553_s30   ;;  %s1845_s29 = sphi %s1933_s29, %s2552_s29   ;;  %s1841_s28 = sphi %s1931_s28, %s2541_s28   ;;  %s1837_s27 = sphi %s1929_s27, %s2551_s27   ;;  %s1833_s26 = sphi %s1927_s26, %s2550_s26   ;;  %s1829_s25 = sphi %s1925_s25, %s2549_s25   ;;  %s1825_s24 = sphi %s1923_s24, %s2548_s24   ;;  %s1821_s23 = sphi %s1921_s23, %s2547_s23  }
   0xf   : > { %2520 = sst [smem:[#allocation13_spill]] %s1853_s5  ;;  %s35_s13 = sadd.s32 1, %s1857_s7 }
  0x10   : > { %2521 = sst [smem:[#allocation14_spill]] %s1861_s8  ;;  %s38_s14 = sadd.s32 1, %s1861_s8 }
  0x11   : > { %p36_p0 = scmp.ge.s32.totalorder %s35_s13, 2  ;;  %s42_s15 = sadd.s32 1, %s1865_s9 }
  0x12   : > { %p58_p1 = scmp.ne.s32.totalorder %s1841_s28, %s1837_s27  ;;  %p59_p2 = scmp.eq.s32.totalorder %s1869_s10, 0 }
  0x13   : > { %s2558_s13 = smov (%p36_p0, %s35_s13), 0  ;;  %s2560_s14 = smov (!%p36_p0, %s38_s14), %s1861_s8 }
  0x14   : > { %2522 = sst [smem:[#allocation15_spill]] %s2558_s13  ;;  %s47_s17 = ssub.s32 %s1857_s7, %s2558_s13 }
  0x15   : > { %p40_p3 = scmp.ge.s32.totalorder %s2560_s14, 2  ;;  %p64_p4 = scmp.ne.s32.totalorder %s1837_s27, %s1833_s26 }
  0x16   : > { %p1999_p5 = por %p59_p2, %p58_p1  ;;  %p65_p6 = scmp.eq.s32.totalorder %s1466_s11, 0 }
  0x17   : > { %s2562_s14 = smov (%p40_p3, %s2560_s14), 0  ;;  %s2564_s15 = smov (!%p40_p3, %s42_s15), %s1865_s9 }
  0x18   : > { %2524 = sst [smem:[#allocation16_spill]] %s2562_s14  ;;  %p2006_p7 = por %p65_p6, %p64_p4 }
  0x19   : > { %s179_s20 = smul.u32 %s1857_s7, %s1861_s8  ;;  %p44_p8 = scmp.ge.s32.totalorder %s2564_s15, 2 }
  0x1a   : > { %s180_s21 = smul.u32 %s2562_s14, %s2558_s13  ;;  %s186_s22 = sadd.s32 1, %s1829_s25 }
  0x1b   : > { %p196_p9 = scmp.ne.s32.totalorder %s1829_s25, %s1825_s24  ;;  %s2566_s15 = smov (%p44_p8, %s2564_s15), 0 }
  0x1c   : > { %2526 = sst [smem:[#allocation17_spill]] %s2566_s15  ;;  %s182_s26 = ssub.s32 %s179_s20, %s180_s21 }
  0x1d   : > { %p197_p10 = scmp.eq.s32.totalorder %s1466_s11, 7  ;;  %s46_s16 = ssub.s32 %s1865_s9, %s2566_s15 }
  0x1e   : > { %p202_p11 = scmp.ne.s32.totalorder %s1825_s24, %s1821_s23  ;;  %s48_s12 = sor.u32 %s47_s17, %s46_s16 }
  0x1f   : > { %s183_s8 = sor.u32 %s182_s26, %s46_s16  ;;  %p49_p12 = scmp.eq.s32.totalorder %s48_s12, 0 }
  0x20   : > { %p184_p13 = scmp.eq.s32.totalorder %s183_s8, 0  ;;  %p2023_p0 = por %p197_p10, %p196_p9 }
  0x21   : > { %s2528_s13 = sadd.s32 4294967294, %s1869_s10   ;;  %s2529_s6 = sadd.s32 1, %s1841_s28 }
  0x22   : > { %s2527_s14 = scalar_select %p2023_p0, 1, 0 }
  0x23   : > { %p203_p1 = scmp.eq.s32.totalorder %s2528_s13, 7  ;;  %p1554_p3 = scmp.lt.s32.totalorder %s1869_s10, 8 }
  0x24   : > { %s2032_s5 = scalar_select %p49_p12, %s1841_s28, %s2529_s6  }
  0x25   : > { %s2035_s20 = scalar_select %p184_p13, %s1829_s25, %s186_s22  }
  0x26   : > { %2530 = sst [smem:[#allocation18_spill]] %s2032_s5  ;;  %p2037_p2 = por %p203_p1, %p202_p11 }
  0x27   : > { %s238_s12 = sand.u32 1, %s1841_s28   ;;  %s1471_s16 = sshll.u32 %s1857_s7, 2 }
  0x28   : > { %s2531_s11 = scalar_select %p2037_p2, 1, 0 }
  0x29   : > { %s1470_s8 = sshll.u32 %s238_s12, 6  ;;  %s1472_s17 = sshll.u32 %s1865_s9, 5 }
  0x2a   : > { %s242_s21 = scalar_lea.vmem [#allocation6], %s1470_s8  ;;  %s248_s15 = sadd.s32 %s1472_s17, %s1471_s16 }
  0x2b   : > { %s251_s26 = sshll.u32 %s242_s21, 4  ;;  %s1473_s13 = sshll.u32 %s248_s15, 6  ;;  %s2045_s26 = int_to_ptr.vmem [resolvable:$true] %s251_s26 }
  0x2c   : > { %p2049_p4 = pnand %p1554_p3, %p1999_p5  ;;  %s2533_s0 = sld [smem:[#allocation19_spill]] }
  0x2d   : > { %s2059_s8 = scalar_lea.sflag [#allocation7], %s238_s12 }
  0x2e   : > { %p1703_p5 = pneg %p2049_p4 }
  0x32   : > { %s2056_s28 = scalar_lea.hbm %s2533_s0, %s1473_s13  ;;  %s1706_s16 = scalar_lea.hbm %s2533_s0, 4096 }
  0x33   : > { %s1701_s15 = scalar_lea.hbm %s2056_s28, 1024  ;;  %p1707_p11 = scmp.lt.u32.totalorder %s2056_s28, %s2533_s0 }
  0x34   : > { %p1702_p8 = scmp.ne.s32.totalorder %s2056_s28, %s1701_s15  ;;  %p1708_p12 = scmp.lt.u32.totalorder %s1706_s16, %s1701_s15 }
  0x35   : > { %p1710_p1 = scmp.lt.u32.totalorder %s1701_s15, %s2056_s28 }
  0x36   : > { %p1704_p9 = pnand %p1703_p5, %p1702_p8  ;;  %p1709_p13 = por %p1708_p12, %p1707_p11 }
  0x38   : > { %p1705_p10 = pneg %p1704_p9  ;;  %p1711_p3 = por %p1710_p1, %p1709_p13 }
  0x3a   : > { %p1712_p6 = pnand %p1711_p3, %p1705_p10 }
  0x3c   : > { %1715 = shalt.err (!%p1712_p6)
}
  0x3d   : > { %s1716_s12 = scalar_lea.vmem %s2045_s26, 1024  ;;  %s1871_s13 = smov [#allocation6]  }
  0x3e   : > { %p1717_p8 = scmp.ne.s32.totalorder %s2045_s26, %s1716_s12  ;;  %s1721_s22 = sshll.u32 %s1871_s13, 4  ;;  %s1722_s22 = int_to_ptr.vmem [resolvable:$false] %s1721_s22 }
  0x3f   : > { %s1723_s5 = scalar_lea.vmem %s1722_s22, 2048  ;;  %p1724_p0 = scmp.lt.s32.totalorder %s2045_s26, %s1722_s22 }
  0x40   : > { %p1719_p9 = pnand %p1717_p8, %p1703_p5  ;;  %p1725_p11 = scmp.lt.s32.totalorder %s1723_s5, %s1716_s12 }
  0x42   : > { %p1720_p2 = pneg %p1719_p9  ;;  %p1726_p12 = por %p1725_p11, %p1724_p0 }
  0x44   : > { %p1727_p13 = pnand %p1726_p12, %p1720_p2 }
  0x46   : > { %1730 = shalt.err (!%p1727_p13)
}
  0x47   : > { %s1872_s15 = smov 512   ;;  %s1873_s18 = smov 256  }
  0x48   : > { %s1874_s16 = smov 16   ;;  %p259_p6 = scmp.lt.s32.totalorder %s1869_s10, 9 }
  0x49   : > { %1549 = dma.hbm_to_vmem [thread:$0]  (!%p2049_p4), %s2056_s28, 1024, %s2045_s26, %s2059_s8, %s1872_s15, %s1873_s18, %s1874_s16  }
  0x4a   : > { %p2534_p5 = scmp.ge.s32.totalorder %s1869_s10, 1 }
  0x4c   : > { %p260_p10 = pnand %p2534_p5, %p259_p6 }
  0x4d   : > { %s265_s17 = sand.u32 (!%p260_p10), 1, %s1837_s27  }
  0x4e   : > { %263 = sbr.rel (%p260_p10) target bundleno = 1109 (0x455), region = 44  ;;  %s1475_s21 = sshll.u32 (!%p260_p10), %s265_s17, 6 }
  0x4f   : > { %s266_s12 = scalar_lea.sflag (!%p260_p10), [#allocation7], %s265_s17  ;;  %s269_s13 = scalar_lea.vmem (!%p260_p10), [#allocation6], %s1475_s21 }
  0x55   : > { %1812 = dma.done.wait (%p2006_p7), %s266_s12, 1024  }
  0x56   : > { %1814 = vsyncadd (%p2006_p7), %s266_s12, 4294966272  ;;  %s295_s22 = sand.u32 1, %s1825_s24   ;;  %v2098_v0 = vld [vmem:[%s269_s13] sm:$0xff]  ;;  %v2100_v1 = vld [vmem:[%s269_s13 + $0x8] sm:$0xff]  ;;  %p1477_p7 = scmp.ne.s32.totalorder %s1849_s30, 0 }
  0x57   : > { %s1476_s28 = sshll.u32 %s295_s22, 7  ;;  %v2102_v2 = vld [vmem:[%s269_s13 + $0x10] sm:$0xff]  ;;  %v2104_v3 = vld [vmem:[%s269_s13 + $0x18] sm:$0xff]  ;;  %v2106_v4 = vld [vmem:[%s269_s13 + $0x20] sm:$0xff]  ;;  %p1478_p0 = scmp.ne.s32.totalorder (!%p1477_p7), %s1845_s29, 0 }
  0x58   : > { %v2108_v5 = vld [vmem:[%s269_s13 + $0x28] sm:$0xff]  ;;  %v2110_v6 = vld [vmem:[%s269_s13 + $0x30] sm:$0xff]  ;;  %v2112_v7 = vld [vmem:[%s269_s13 + $0x38] sm:$0xff]  ;;  %s2114_s19 = scalar_lea.vmem [#allocation9], %s1476_s28  ;;  %313 = sbr.rel (%p1477_p7) target bundleno = 589 (0x24d), region = 52 }
  0x5f   : > { %317 = sbr.rel (%p1478_p0) target bundleno = 102 (0x66), region = 56  ;;  %vm318_vm0 = vcmask (!%p1478_p0), 7168   ;;  %vm324_vm1 = vcmask (!%p1478_p0), 64512   ;;  %v1875_v8 = vmov (!%p1478_p0), 0.0  }
  0x60   : > { %319 = vst.msk [vmem:[#allocation2] sm:$0xff] (!%p1478_p0), %vm318_vm0, %v1875_v8  ;;  %320 = vst.msk [vmem:[#allocation3] sm:$0xff] (!%p1478_p0), %vm318_vm0, %v1875_v8 }
  0x61   : > { %321 = vst.msk [vmem:[#allocation3 + $0x8] sm:$0xff] (!%p1478_p0), %vm318_vm0, %v1875_v8  ;;  %322 = vst.msk [vmem:[#allocation3 + $0x10] sm:$0xff] (!%p1478_p0), %vm318_vm0, %v1875_v8 }
  0x62   : > { %323 = vst.msk [vmem:[#allocation3 + $0x18] sm:$0xff] (!%p1478_p0), %vm318_vm0, %v1875_v8 }
  0x63   : > { %325 = vst.msk [vmem:[#allocation4] sm:$0xff] (!%p1478_p0), %vm324_vm1, %v1875_v8  ;;  %326 = vst.msk [vmem:[#allocation4 + $0x8] sm:$0xff] (!%p1478_p0), %vm324_vm1, %v1875_v8 }
  0x64   : > { %327 = vst.msk [vmem:[#allocation4 + $0x10] sm:$0xff] (!%p1478_p0), %vm324_vm1, %v1875_v8  ;;  %328 = vst.msk [vmem:[#allocation4 + $0x18] sm:$0xff] (!%p1478_p0), %vm324_vm1, %v1875_v8 }
  0x66 PF: > { %v1483_v9 = vcombine.high %v2098_v0, %v2102_v2  ;;  %v1485_v10 = vcombine.high %v2100_v1, %v2104_v3  ;;  %v1482_v11 = vcombine.low %v2098_v0, %v2102_v2  ;;  %v1484_v12 = vcombine.low %v2100_v1, %v2104_v3  ;;  %v334_v18 = vld [vmem:[%s2505_s2] sm:$0xff]  ;;  %v336_v19 = vld [vmem:[%s2505_s2 + $0x10] sm:$0xff]  ;;  %v335_v21 = vld [vmem:[%s2505_s2 + $0x8] sm:$0xff]  ;;  %s1496_s15 = sshll.u32 %s1845_s29, 9 }
  0x67   : > { %v1487_v13 = vcombine.high %v2106_v4, %v2110_v6  ;;  %v1489_v14 = vcombine.high %v2108_v5, %v2112_v7  ;;  %v1486_v15 = vcombine.low %v2106_v4, %v2110_v6  ;;  %v1488_v16 = vcombine.low %v2108_v5, %v2112_v7  ;;  %v1672_v20 = vld [vmem:[%s2504_s1] sm:$0xff]   ;;  %v337_v22 = vld [vmem:[%s2505_s2 + $0x18] sm:$0xff]  ;;  %v1673_v24 = vld [vmem:[%s2504_s1 + $0x8] sm:$0xff]  }
  0x68   : > { %427 = vmatprep.subr.bf16.mxu0 %v1483_v9  ;;  %488 = vmatprep.subr.bf16.mxu1 %v1485_v10  ;;  %v1876_v17 = vmov 0   ;;  %vm417_vm2 = vcmask 261120   ;;  %v338_v23 = vld [vmem:[%s2505_s2 + $0x20] sm:$0xff]  ;;  %v1674_v25 = vld [vmem:[%s2504_s1 + $0x10] ss:$0 sps:$4 sm:$0xff]   ;;  %v586_v26 = vlaneseq  ;;  %v591_v29 = vstv %s1496_s15 }
  0x69   : > { %428 = vmatpush1.bf16.msra.mxu0 %v1482_v11  ;;  %489 = vmatpush1.bf16.msra.mxu1 %v1484_v12  ;;  %vm635_vm7 = vcmask 7168   ;;  %vm847_vm8 = vcmask 64512  }
  0x6a   : > { %429 = vmatprep.subr.bf16.mxu0 %v1487_v13  ;;  %490 = vmatprep.subr.bf16.mxu1 %v1489_v14  ;;  %v587_v27 = vand.u32 127, %v586_v26 }
  0x6b   : > { %459 = vmatprep.mubr.bf16.mxu0 %v1876_v17  ;;  %520 = vmatprep.mubr.bf16.mxu1 %v1876_v17 }
  0x6c   : > { %1670 = vset.pattern.permute.xlu0 %v1876_v17  ;;  %1671 = vset.pattern.permute.xlu1 %v1876_v17  ;;  %v588_v30 = vadd.s32 128, %v587_v27  ;;  %v590_v31 = vadd.s32 384, %v587_v27  ;;  %v2165_v32 = vadd.s32 %v591_v29, %v587_v27  ;;  %v589_v33 = vadd.s32 256, %v587_v27 }
  0x6d   : > { %430 = vmatpush1.bf16.msra.mxu0 %v1486_v15  ;;  %491 = vmatpush1.bf16.msra.mxu1 %v1488_v16 }
  0x6e   : > { %341 = vperm.xlu0 %1670, %v334_v18   ;;  %351 = vperm.xlu1 %1671, %v336_v19   ;;  %v2167_v34 = vadd.s32 %v591_v29, %v588_v30  ;;  %v2169_v35 = vadd.s32 %v591_v29, %v590_v31  ;;  %vm596_vm3 = vcmp.lt.s32.totalorder %v2165_v32, 900  ;;  %v2176_v44 = vadd.s32 %v591_v29, %v589_v33  ;;  %v628_v32 = vld [vmem:[#allocation2] sm:$0xff] }
  0x70   : > { %1490 = vmatmul.mubr.msk.bf16.vlgmr.msra.gmra.mrb[0].mxu0 %vm417_vm2, %v1672_v20  ;;  %1493 = vmatmul.mubr.msk.bf16.vlgmr.msra.gmra.mrb[0].mxu1 %vm417_vm2, %v1672_v20  ;;  %vm597_vm4 = vcmp.lt.s32.totalorder %v2167_v34, 900  ;;  %vm599_vm5 = vcmp.lt.s32.totalorder %v2169_v35, 900  ;;  %vm598_vm6 = vcmp.lt.s32.totalorder %v2176_v44, 900  ;;  %v640_v35 = vld [vmem:[#allocation3 + $0x18] sm:$0xff] }
  0x71   : > { %469 = vmatprep.mubr.bf16.mxu0 %v1876_v17  ;;  %530 = vmatprep.mubr.bf16.mxu1 %v1876_v17 }
  0x72   : > { %346 = vperm.xlu0 %1670, %v335_v21   ;;  %356 = vperm.xlu1 %1671, %v337_v22  }
  0x76   : > { %361 = vperm.xlu0 %1670, %v338_v23  }
  0x78   : > { %1491 = vmatmul.mubr.msk.bf16.gmra.mrb[4].mxu0 %vm417_vm2, %v1673_v24  ;;  %1494 = vmatmul.mubr.msk.bf16.gmra.mrb[4].mxu1 %vm417_vm2, %v1673_v24 }
  0x79   : > { %479 = vmatprep.mubr.bf16.mxu0 %v1876_v17  ;;  %540 = vmatprep.mubr.bf16.mxu1 %v1876_v17 }
  0x80   : > { %1492 = vmatmul.mubr.msk.bf16.gmra.mrb[8].mxu0 %vm417_vm2, %v1674_v25  ;;  %1495 = vmatmul.mubr.msk.bf16.gmra.mrb[8].mxu1 %vm417_vm2, %v1674_v25 }
  0xed   : > { %v342_v28 = vpop.permute.xlu0 %341  ;;  %v352_v37 = vpop.permute.xlu1 %351 }
  0xf1   : > { %v347_v36 = vpop.permute.xlu0 %346  ;;  %v357_v12 = vpop.permute.xlu1 %356 }
 0x143   : > { %v461_v38 = vpop.f32.mrb[0].mxu0  ;;  %v522_v39 = vpop.f32.mrb[0].mxu1 }
 0x144   : > { %v2171_v40 = vadd.f32 %v461_v38, %v342_v28  ;;  %v2174_v41 = vadd.f32 %v522_v39, %v342_v28  ;;  %v463_v42 = vpop.f32.mrb[1].mxu0  ;;  %v524_v43 = vpop.f32.mrb[1].mxu1 }
 0x145   : > { %v2178_v45 = vadd.f32 %v463_v42, %v342_v28  ;;  %v2181_v46 = vadd.f32 %v524_v43, %v342_v28  ;;  %v465_v47 = vpop.f32.mrb[2].mxu0  ;;  %v526_v48 = vpop.f32.mrb[2].mxu1 }
 0x146   : > { %v549_v49 = vmul.f32 %v2171_v40, %v2171_v40  ;;  %v551_v50 = vmul.f32 %v2174_v41, %v2174_v41  ;;  %v2188_v51 = vadd.f32 %v465_v47, %v347_v36  ;;  %v2190_v52 = vadd.f32 %v526_v48, %v347_v36  ;;  %v467_v53 = vpop.f32.mrb[3].mxu0  ;;  %v528_v54 = vpop.f32.mrb[3].mxu1 }
 0x147   : > { %v550_v55 = vmul.f32 %v2178_v45, %v2178_v45  ;;  %v552_v56 = vmul.f32 %v2181_v46, %v2181_v46  ;;  %v468_v57 = vadd.f32 %v467_v53, %v347_v36  ;;  %v529_v58 = vadd.f32 %v528_v54, %v347_v36 }
 0x148   : > { %v553_v59 = vrot.slane %v549_v49, 4  ;;  %v565_v60 = vrot.slane %v551_v50, 4  ;;  %v612_v61 = vsel %vm596_vm3, %v2188_v51, 0.0  ;;  %v614_v15 = vsel %vm598_vm6, %v2190_v52, 0.0 }
 0x149   : > { %v559_v62 = vrot.slane %v550_v55, 4  ;;  %v571_v63 = vrot.slane %v552_v56, 4  ;;  %v613_v8 = vsel %vm597_vm4, %v468_v57, 0.0  ;;  %1499 = vmatprep.mubr.msk.f32.mxu0 %vm597_vm4, %v468_v57  ;;  %1509 = vmatprep.mubr.msk.f32.mxu1 %vm599_vm5, %v529_v58  ;;  %v615_v18 = vsel %vm599_vm5, %v529_v58, 0.0 }
 0x14a   : > { %v554_v9 = vadd.f32 %v553_v59, %v549_v49  ;;  %v566_v10 = vadd.f32 %v565_v60, %v551_v50  ;;  %v641_v11 = vadd.f32 %v613_v8, %v612_v61  ;;  %v362_v61 = vpop.permute.xlu0 %361 }
 0x14b   : > { %v560_v13 = vadd.f32 %v559_v62, %v550_v55  ;;  %v572_v14 = vadd.f32 %v571_v63, %v552_v56  ;;  %v471_v16 = vpop.f32.mrb[4].mxu0  ;;  %v532_v17 = vpop.f32.mrb[4].mxu1 }
 0x14c   : > { %v555_v19 = vrot.slane %v554_v9, 2  ;;  %v567_v20 = vrot.slane %v566_v10, 2  ;;  %v2211_v21 = vadd.f32 %v471_v16, %v352_v37  ;;  %v2213_v22 = vadd.f32 %v532_v17, %v352_v37  ;;  %v473_v23 = vpop.f32.mrb[5].mxu0  ;;  %v534_v24 = vpop.f32.mrb[5].mxu1 }
 0x14d   : > { %v561_v25 = vrot.slane %v560_v13, 2  ;;  %v573_v26 = vrot.slane %v572_v14, 2  ;;  %v2215_v27 = vadd.f32 %v473_v23, %v352_v37  ;;  %v2217_v28 = vadd.f32 %v534_v24, %v352_v37  ;;  %v475_v29 = vpop.f32.mrb[6].mxu0  ;;  %v536_v30 = vpop.f32.mrb[6].mxu1 }
 0x14e   : > { %v556_v31 = vadd.f32 %v555_v19, %v554_v9  ;;  %v568_v33 = vadd.f32 %v567_v20, %v566_v10  ;;  %v616_v36 = vsel %vm596_vm3, %v2211_v21, 0.0  ;;  %v642_v38 = vadd.f32 %v641_v11, %v614_v15  ;;  %v477_v39 = vpop.f32.mrb[7].mxu0  ;;  %v538_v42 = vpop.f32.mrb[7].mxu1 }
 0x14f   : > { %v562_v43 = vadd.f32 %v561_v25, %v560_v13  ;;  %v574_v47 = vadd.f32 %v573_v26, %v572_v14  ;;  %v617_v48 = vsel %vm597_vm4, %v2215_v27, 0.0  ;;  %v618_v37 = vsel %vm598_vm6, %v2213_v22, 0.0 }
 0x150   : > { %v557_v49 = vrot.slane %v556_v31, 1  ;;  %v569_v50 = vrot.slane %v568_v33, 1  ;;  %v646_v53 = vadd.f32 %v617_v48, %v616_v36  ;;  %v643_v54 = vadd.f32 %v642_v38, %v615_v18 }
 0x151   : > { %v563_v55 = vrot.slane %v562_v43, 1  ;;  %v575_v56 = vrot.slane %v574_v47, 1  ;;  %v619_v57 = vsel %vm599_vm5, %v2217_v28, 0.0  ;;  %v2231_v58 = vadd.f32 %v475_v29, %v357_v12 }
 0x152   : > { %v558_v59 = vadd.f32 %v557_v49, %v556_v31  ;;  %v570_v60 = vadd.f32 %v569_v50, %v568_v33  ;;  %644 = vadd.xlane.f32.xlu0 %v643_v54  ;;  %v647_v62 = vadd.f32 %v646_v53, %v618_v37  ;;  %v2233_v63 = vadd.f32 %v477_v39, %v357_v12 }
 0x153   : > { %v564_v8 = vadd.f32 %v563_v55, %v562_v43  ;;  %v576_v9 = vadd.f32 %v575_v56, %v574_v47  ;;  %v481_v10 = vpop.f32.mrb[8].mxu0  ;;  %v542_v11 = vpop.f32.mrb[8].mxu1  ;;  %v2235_v13 = vadd.f32 %v536_v30, %v357_v12  ;;  %v539_v18 = vadd.f32 %v538_v42, %v357_v12 }
 0x154   : > { %1675 = vrsqrt.f32 %v558_v59  ;;  %v2237_v14 = vadd.f32 %v481_v10, %v362_v61  ;;  %v483_v15 = vpop.f32.mrb[9].mxu0  ;;  %v544_v16 = vpop.f32.mrb[9].mxu1  ;;  %v648_v17 = vadd.f32 %v647_v62, %v619_v57  ;;  %v543_v19 = vadd.f32 %v542_v11, %v362_v61  ;;  %v639_v10 = vld [vmem:[#allocation3 + $0x10] sm:$0xff] }
 0x155   : > { %1677 = vrsqrt.f32 %v570_v60  ;;  %v484_v20 = vadd.f32 %v483_v15, %v362_v61  ;;  %v620_v23 = vsel %vm596_vm3, %v2231_v58, 0.0  ;;  %v485_v24 = vpop.f32.mrb[10].mxu0  ;;  %v546_v25 = vpop.f32.mrb[10].mxu1  ;;  %v621_v29 = vsel %vm597_vm4, %v2233_v63, 0.0  ;;  %v669_v15 = vld [vmem:[#allocation4] sm:$0xff] }
 0x156   : > { %1679 = vrsqrt.f32 %v564_v8  ;;  %v624_v26 = vsel %vm596_vm3, %v2237_v14, 0.0  ;;  %649 = vadd.xlane.f32.xlu0 %v648_v17  ;;  %v486_v12 = vpop.f32.mrb[11].mxu0  ;;  %v547_v30 = vpop.f32.mrb[11].mxu1  ;;  %v545_v33 = vadd.f32 %v544_v16, %v362_v61  ;;  %v622_v36 = vsel %vm598_vm6, %v2235_v13, 0.0  ;;  %v670_v24 = vld [vmem:[#allocation4 + $0x8] sm:$0xff] }
 0x157   : > { %1681 = vrsqrt.f32 %v576_v9  ;;  %v625_v31 = vsel %vm597_vm4, %v484_v20, 0.0  ;;  %v651_v39 = vadd.f32 %v621_v29, %v620_v23  ;;  %v626_v42 = vsel %vm598_vm6, %v543_v19, 0.0 }
 0x158   : > { %v656_v38 = vadd.f32 %v625_v31, %v624_v26  ;;  %v623_v43 = vsel %vm599_vm5, %v539_v18, 0.0  ;;  %v627_v37 = vsel %vm599_vm5, %v545_v33, 0.0 }
 0x159   : > { %v652_v48 = vadd.f32 %v651_v39, %v622_v36 }
 0x15a   : > { %v657_v47 = vadd.f32 %v656_v38, %v626_v42 }
 0x15b   : > { %v653_v50 = vadd.f32 %v652_v48, %v623_v43  ;;  %v672_v48 = vld [vmem:[#allocation4 + $0x18] sm:$0xff] }
 0x15c   : > { %v658_v49 = vadd.f32 %v657_v47, %v627_v37 }
 0x15e   : > { %v1676_v53 = vpop.eup %1675  ;;  %659 = vadd.xlane.f32.xlu0 %v658_v49 }
 0x15f   : > { %v1678_v54 = vpop.eup %1677  ;;  %v581_v55 = vmul.f32 %v1676_v53, %v2171_v40 }
 0x160   : > { %v1680_v56 = vpop.eup %1679  ;;  %v583_v60 = vmul.f32 %v1678_v54, %v2174_v41 }
 0x161   : > { %v1682_v57 = vpop.eup %1681  ;;  %v608_v59 = vsel %vm596_vm3, %v581_v55, 0.0  ;;  %v582_v61 = vmul.f32 %v1680_v56, %v2178_v45 }
 0x162   : > { %v584_v62 = vmul.f32 %v1682_v57, %v2181_v46  ;;  %v610_v41 = vsel %vm598_vm6, %v583_v60, 0.0 }
 0x163   : > { %v609_v8 = vsel %vm597_vm4, %v582_v61, 0.0  ;;  %1497 = vmatprep.subr.msk.mxu0 %vm597_vm4, %v582_v61 }
 0x164   : > { %1507 = vmatprep.subr.msk.mxu1 %vm599_vm5, %v584_v62  ;;  %1498 = vmatpush1.xpose.msk.msra.mxu0 %vm596_vm3, %v581_v55  ;;  %v629_v40 = vadd.f32 %v609_v8, %v608_v59  ;;  %v611_v46 = vsel %vm599_vm5, %v584_v62, 0.0 }
 0x165   : > { %1508 = vmatpush1.xpose.msk.msra.mxu1 %vm598_vm6, %v583_v60 }
 0x166   : > { %v630_v45 = vadd.f32 %v629_v40, %v610_v41 }
 0x167   : > { %1500 = vmatmul.mubr.msk.f32.vlgmr.msra.gmra.mrb[12].mxu0 %vm596_vm3, %v2188_v51  ;;  %v637_v51 = vld [vmem:[#allocation3] sm:$0xff] }
 0x168   : > { %1510 = vmatmul.mubr.msk.f32.vlgmr.msra.gmra.mrb[12].mxu1 %vm598_vm6, %v2190_v52  ;;  %1501 = vmatprep.mubr.msk.f32.mxu0 %vm597_vm4, %v2215_v27  ;;  %v631_v9 = vadd.f32 %v630_v45, %v611_v46 }
 0x169   : > { %1511 = vmatprep.mubr.msk.f32.mxu1 %vm599_vm5, %v2217_v28 }
 0x16a   : > { %632 = vadd.xlane.f32.xlu1 %v631_v9 }
 0x16b   : > { %1502 = vmatmul.mubr.msk.f32.gmra.mrb[14].mxu0 %vm596_vm3, %v2211_v21 }
 0x16c   : > { %1512 = vmatmul.mubr.msk.f32.gmra.mrb[14].mxu1 %vm598_vm6, %v2213_v22  ;;  %1503 = vmatprep.mubr.msk.f32.mxu0 %vm597_vm4, %v2233_v63  ;;  %v638_v22 = vld [vmem:[#allocation3 + $0x8] sm:$0xff] }
 0x16d   : > { %1513 = vmatprep.mubr.msk.f32.mxu1 %vm599_vm5, %v539_v18 }
 0x16e   : > { %654 = vadd.xlane.f32.xlu1 %v653_v50 }
 0x16f   : > { %1504 = vmatmul.mubr.msk.f32.gmra.mrb[16].mxu0 %vm596_vm3, %v2231_v58 }
 0x170   : > { %1514 = vmatmul.mubr.msk.f32.gmra.mrb[16].mxu1 %vm598_vm6, %v2235_v13  ;;  %1505 = vmatprep.mubr.msk.f32.mxu0 %vm597_vm4, %v484_v20 }
 0x171   : > { %1515 = vmatprep.mubr.msk.f32.mxu1 %vm599_vm5, %v545_v33  ;;  %v671_v33 = vld [vmem:[#allocation4 + $0x10] sm:$0xff] }
 0x173   : > { %1506 = vmatmul.mubr.msk.f32.gmra.mrb[18].mxu0 %vm596_vm3, %v2237_v14 }
 0x174   : > { %1516 = vmatmul.mubr.msk.f32.gmra.mrb[18].mxu1 %vm598_vm6, %v543_v19 }
 0x1df   : > { %v645_v52 = vpop.xlane.xlu0 %644 }
 0x1e0   : > { %v661_v21 = vadd.f32 %v645_v52, %v637_v51 }
 0x1e2   : > { %665 = vst.msk [vmem:[#allocation3] sm:$0xff] %vm635_vm7, %v661_v21 }
 0x1e3   : > { %v650_v27 = vpop.xlane.xlu0 %649 }
 0x1e4   : > { %v662_v34 = vadd.f32 %v650_v27, %v638_v22 }
 0x1e6   : > { %666 = vst.msk [vmem:[#allocation3 + $0x8] sm:$0xff] %vm635_vm7, %v662_v34 }
 0x1eb   : > { %v660_v28 = vpop.xlane.xlu0 %659 }
 0x1ec   : > { %v664_v58 = vadd.f32 %v660_v28, %v640_v35 }
 0x1ee   : > { %668 = vst.msk [vmem:[#allocation3 + $0x18] sm:$0xff] %vm635_vm7, %v664_v58 }
 0x1f7   : > { %v633_v63 = vpop.xlane.xlu1 %632 }
 0x1f8   : > { %v634_v44 = vadd.f32 %v633_v63, %v628_v32 }
 0x1fa   : > { %636 = vst.msk [vmem:[#allocation2] sm:$0xff] %vm635_vm7, %v634_v44 }
 0x1fb   : > { %v655_v11 = vpop.xlane.xlu1 %654 }
 0x1fc   : > { %v663_v13 = vadd.f32 %v655_v11, %v639_v10 }
 0x1fe   : > { %667 = vst.msk [vmem:[#allocation3 + $0x10] sm:$0xff] %vm635_vm7, %v663_v13 }
 0x23a   : > { %v739_v14 = vpop.f32.mrb[12].mxu0 }
 0x23b   : > { %v824_v16 = vpop.f32.mrb[12].mxu1  ;;  %v741_v17 = vpop.f32.mrb[13].mxu0 }
 0x23c   : > { %v825_v18 = vadd.f32 %v824_v16, %v739_v14  ;;  %v826_v19 = vpop.f32.mrb[13].mxu1 }
 0x23e   : > { %v843_v20 = vadd.f32 %v825_v18, %v669_v15  ;;  %v744_v23 = vpop.f32.mrb[14].mxu0 }
 0x23f   : > { %v829_v25 = vpop.f32.mrb[14].mxu1  ;;  %v746_v26 = vpop.f32.mrb[15].mxu0 }
 0x240   : > { %848 = vst.msk [vmem:[#allocation4] sm:$0xff] %vm847_vm8, %v843_v20  ;;  %v830_v29 = vadd.f32 %v829_v25, %v744_v23  ;;  %v831_v12 = vpop.f32.mrb[15].mxu1 }
 0x242   : > { %v844_v30 = vadd.f32 %v830_v29, %v670_v24  ;;  %v749_v31 = vpop.f32.mrb[16].mxu0 }
 0x243   : > { %v834_v36 = vpop.f32.mrb[16].mxu1  ;;  %v751_v38 = vpop.f32.mrb[17].mxu0 }
 0x244   : > { %849 = vst.msk [vmem:[#allocation4 + $0x8] sm:$0xff] %vm847_vm8, %v844_v30  ;;  %v835_v39 = vadd.f32 %v834_v36, %v749_v31  ;;  %v836_v42 = vpop.f32.mrb[17].mxu1 }
 0x246   : > { %v845_v43 = vadd.f32 %v835_v39, %v671_v33  ;;  %v754_v47 = vpop.f32.mrb[18].mxu0 }
 0x247   : > { %v839_v37 = vpop.f32.mrb[18].mxu1  ;;  %v756_v49 = vpop.f32.mrb[19].mxu0 }
 0x248   : > { %850 = vst.msk [vmem:[#allocation4 + $0x10] sm:$0xff] %vm847_vm8, %v845_v43  ;;  %v840_v50 = vadd.f32 %v839_v37, %v754_v47  ;;  %v841_v53 = vpop.f32.mrb[19].mxu1 }
 0x24a   : > { %v846_v54 = vadd.f32 %v840_v50, %v672_v48 }
 0x24c   : > { %851 = vst.msk [vmem:[#allocation4 + $0x18] sm:$0xff] %vm847_vm8, %v846_v54 }
 0x24d PF: > { %p1517_p2 = scmp.ne.s32.totalorder %s1849_s30, 1 }
 0x24e   : > { %v1519_v55 = vcombine.high (!%p1517_p2), %v2098_v0, %v2102_v2  ;;  %v1521_v56 = vcombine.high (!%p1517_p2), %v2100_v1, %v2104_v3  ;;  %v1518_v57 = vcombine.low (!%p1517_p2), %v2098_v0, %v2102_v2  ;;  %v1520_v59 = vcombine.low (!%p1517_p2), %v2100_v1, %v2104_v3  ;;  %v857_v1 = vld [vmem:[%s2507_s4] sm:$0xff] (!%p1517_p2)  ;;  %v1069_v40 = vld [vmem:[#allocation3 + $0x8] sm:$0xff] (!%p1517_p2)  ;;  %s1303_s12 = sld [smem:[#allocation5]] (!%p1517_p2) }
 0x24f   : > { %855 = sbr.rel (%p1517_p2) target bundleno = 1078 (0x436), region = 60  ;;  %v1523_v60 = vcombine.high (!%p1517_p2), %v2106_v4, %v2110_v6  ;;  %v1525_v61 = vcombine.high (!%p1517_p2), %v2108_v5, %v2112_v7  ;;  %v1522_v62 = vcombine.low (!%p1517_p2), %v2106_v4, %v2110_v6  ;;  %v1524_v8 = vcombine.low (!%p1517_p2), %v2108_v5, %v2112_v7  ;;  %v1025_v2 = vld [vmem:[#allocation2] sm:$0xff] (!%p1517_p2)  ;;  %v1070_v5 = vld [vmem:[#allocation3 + $0x10] sm:$0xff] (!%p1517_p2)  ;;  %v1068_v7 = vld [vmem:[#allocation3] sm:$0xff] (!%p1517_p2) }
 0x250   : > { %907 = vmatprep.subr.bf16.mxu0 (!%p1517_p2), %v1519_v55  ;;  %948 = vmatprep.subr.bf16.mxu1 (!%p1517_p2), %v1521_v56  ;;  %v1877_v0 = vmov (!%p1517_p2), 0   ;;  %v856_v3 = vld [vmem:[%s2506_s3] sm:$0xf] (!%p1517_p2)  ;;  %vm903_vm9 = vcmask (!%p1517_p2), 261120   ;;  %v1026_v4 = vadd.f32 (!%p1517_p2), 1e-06, %v1025_v2 }
 0x251   : > { %908 = vmatpush1.bf16.msra.mxu0 (!%p1517_p2), %v1518_v57  ;;  %949 = vmatpush1.bf16.msra.mxu1 (!%p1517_p2), %v1520_v59  ;;  %v1878_v6 = vmov (!%p1517_p2), 0.0   ;;  %v1071_v41 = vld [vmem:[#allocation3 + $0x18] sm:$0xff] (!%p1517_p2)  ;;  %v1072_v57 = vld [vmem:[#allocation4] sm:$0xff] (!%p1517_p2)  ;;  %vm1076_vm10 = vcmask (!%p1517_p2), 64512  }
 0x252   : > { %909 = vmatprep.subr.bf16.mxu0 (!%p1517_p2), %v1523_v60  ;;  %950 = vmatprep.subr.bf16.mxu1 (!%p1517_p2), %v1525_v61  ;;  %v1073_v60 = vld [vmem:[#allocation4 + $0x8] sm:$0xff] (!%p1517_p2)  ;;  %v1074_v61 = vld [vmem:[#allocation4 + $0x10] sm:$0xff] (!%p1517_p2) }
 0x253   : > { %939 = vmatprep.mubr.bf16.mxu0 (!%p1517_p2), %v1877_v0  ;;  %980 = vmatprep.mubr.bf16.mxu1 (!%p1517_p2), %v1877_v0 }
 0x254   : > { %1683 = vset.pattern.permute.xlu0 (!%p1517_p2), %v1877_v0  ;;  %1684 = vset.pattern.permute.xlu1 (!%p1517_p2), %v1877_v0 }
 0x255   : > { %910 = vmatpush1.bf16.msra.mxu0 (!%p1517_p2), %v1522_v62  ;;  %951 = vmatpush1.bf16.msra.mxu1 (!%p1517_p2), %v1524_v8  ;;  %v1075_v62 = vld [vmem:[#allocation4 + $0x18] sm:$0xff] (!%p1517_p2) }
 0x256   : > { %860 = vperm.xlu0 %1683, %v857_v1   ;;  %1269 = vperm.xlu1 %1684, %v1068_v7  }
 0x258   : > { %1526 = vmatmul.mubr.msk.bf16.vlgmr.msra.gmra.mrb[0].mxu0 %vm903_vm9, %v856_v3  ;;  %1527 = vmatmul.mubr.msk.bf16.vlgmr.msra.gmra.mrb[0].mxu1 %vm903_vm9, %v856_v3 }
 0x259   : > { %1153 = vmatprep.mubr.f32.mxu0 %v1878_v6  ;;  %1242 = vmatprep.mubr.f32.mxu1 %v1878_v6 }
 0x25a   : > { %1029 = vperm.xlu0 %1683, %v1026_v4   ;;  %1274 = vperm.xlu1 %1684, %v1069_v40  }
 0x25e   : > { %1279 = vperm.xlu0 %1683, %v1070_v5   ;;  %1284 = vperm.xlu1 %1684, %v1071_v41  }
 0x2d5   : > { %v861_v45 = vpop.permute.xlu0 %860 }
 0x2d9   : > { %v1030_v8 = vpop.permute.xlu0 %1029 }
 0x32b   : > { %v941_v46 = vpop.f32.mrb[0].mxu0  ;;  %v982_v9 = vpop.f32.mrb[0].mxu1 }
 0x32c   : > { %v942_v51 = vadd.f32 %v941_v46, %v861_v45  ;;  %v983_v52 = vadd.f32 %v982_v9, %v861_v45  ;;  %v943_v21 = vpop.f32.mrb[1].mxu0  ;;  %v984_v22 = vpop.f32.mrb[1].mxu1 }
 0x32d   : > { %v944_v27 = vadd.f32 %v943_v21, %v861_v45  ;;  %v985_v34 = vadd.f32 %v984_v22, %v861_v45  ;;  %v945_v35 = vpop.f32.mrb[2].mxu0  ;;  %v986_v28 = vpop.f32.mrb[2].mxu1 }
 0x32e   : > { %v989_v58 = vmul.f32 %v942_v51, %v942_v51  ;;  %v991_v32 = vmul.f32 %v983_v52, %v983_v52  ;;  %v946_v63 = vpop.f32.mrb[3].mxu0  ;;  %v987_v44 = vpop.f32.mrb[3].mxu1 }
 0x32f   : > { %v990_v10 = vmul.f32 %v944_v27, %v944_v27  ;;  %v992_v11 = vmul.f32 %v985_v34, %v985_v34 }
 0x330   : > { %v993_v13 = vrot.slane %v989_v58, 4  ;;  %v1005_v14 = vrot.slane %v991_v32, 4 }
 0x331   : > { %v999_v15 = vrot.slane %v990_v10, 4  ;;  %v1011_v16 = vrot.slane %v992_v11, 4 }
 0x332   : > { %v994_v17 = vadd.f32 %v993_v13, %v989_v58  ;;  %v1006_v18 = vadd.f32 %v1005_v14, %v991_v32 }
 0x333   : > { %v1000_v19 = vadd.f32 %v999_v15, %v990_v10  ;;  %v1012_v20 = vadd.f32 %v1011_v16, %v992_v11 }
 0x334   : > { %v995_v23 = vrot.slane %v994_v17, 2  ;;  %v1007_v24 = vrot.slane %v1006_v18, 2 }
 0x335   : > { %v1001_v25 = vrot.slane %v1000_v19, 2  ;;  %v1013_v26 = vrot.slane %v1012_v20, 2 }
 0x336   : > { %v996_v29 = vadd.f32 %v995_v23, %v994_v17  ;;  %v1008_v12 = vadd.f32 %v1007_v24, %v1006_v18  ;;  %v1270_v18 = vpop.permute.xlu1 %1269 }
 0x337   : > { %v1002_v30 = vadd.f32 %v1001_v25, %v1000_v19  ;;  %v1014_v31 = vadd.f32 %v1013_v26, %v1012_v20  ;;  %v2365_v20 = vstv %s1303_s12 }
 0x338   : > { %v997_v33 = vrot.slane %v996_v29, 1  ;;  %v1009_v36 = vrot.slane %v1008_v12, 1 }
 0x339   : > { %v1003_v38 = vrot.slane %v1002_v30, 1  ;;  %v1015_v39 = vrot.slane %v1014_v31, 1 }
 0x33a   : > { %v998_v42 = vadd.f32 %v997_v33, %v996_v29  ;;  %v1010_v43 = vadd.f32 %v1009_v36, %v1008_v12 }
 0x33b   : > { %v1004_v47 = vadd.f32 %v1003_v38, %v1002_v30  ;;  %v1016_v48 = vadd.f32 %v1015_v39, %v1014_v31 }
 0x33c   : > { %1685 = vrsqrt.f32 %v998_v42  ;;  %v1275_v42 = vpop.permute.xlu1 %1274 }
 0x33d   : > { %1687 = vrsqrt.f32 %v1010_v43 }
 0x33e   : > { %1689 = vrsqrt.f32 %v1004_v47 }
 0x33f   : > { %1691 = vrsqrt.f32 %v1016_v48 }
 0x346   : > { %v1686_v37 = vpop.eup %1685 }
 0x347   : > { %v1688_v49 = vpop.eup %1687  ;;  %v1021_v55 = vmul.f32 %v1686_v37, %v942_v51 }
 0x348   : > { %v1690_v50 = vpop.eup %1689  ;;  %v1023_v59 = vmul.f32 %v1688_v49, %v983_v52 }
 0x349   : > { %v1692_v53 = vpop.eup %1691  ;;  %v1022_v54 = vmul.f32 %v1690_v50, %v944_v27  ;;  %v1032_v0 = vmul.f32 %v1030_v8, %v1021_v55 }
 0x34a   : > { %v1024_v56 = vmul.f32 %v1692_v53, %v985_v34  ;;  %v1034_v1 = vmul.f32 %v1030_v8, %v1023_v59 }
 0x34b   : > { %1089 = vmatprep.subr.mxu0 %v1022_v54  ;;  %v1033_v2 = vmul.f32 %v1030_v8, %v1022_v54  ;;  %v1036_v4 = vrot.slane %v1032_v0, 4 }
 0x34c   : > { %1178 = vmatprep.subr.mxu1 %v1024_v56  ;;  %1090 = vmatpush1.msra.mxu0 %v1021_v55  ;;  %v1035_v3 = vmul.f32 %v1030_v8, %v1024_v56  ;;  %v1048_v5 = vrot.slane %v1034_v1, 4 }
 0x34d   : > { %1179 = vmatpush1.msra.mxu1 %v1023_v59  ;;  %1528 = vmatmul.mubr.msk.f32.vlgmr.msra.gmra.mrb[4].mxu0 %vm1076_vm10, %v1072_v57  ;;  %v1042_v7 = vrot.slane %v1033_v2, 4  ;;  %v1037_v41 = vadd.f32 %v1036_v4, %v1032_v0  ;;  %v1280_v0 = vpop.permute.xlu0 %1279 }
 0x34e   : > { %1532 = vmatmul.mubr.msk.f32.vlgmr.msra.gmra.mrb[4].mxu1 %vm1076_vm10, %v1072_v57  ;;  %1159 = vmatprep.mubr.f32.mxu0 %v1878_v6  ;;  %v1054_v40 = vrot.slane %v1035_v3, 4  ;;  %v1049_v45 = vadd.f32 %v1048_v5, %v1034_v1 }
 0x34f   : > { %1248 = vmatprep.mubr.f32.mxu1 %v1878_v6  ;;  %v1043_v46 = vadd.f32 %v1042_v7, %v1033_v2  ;;  %v1038_v51 = vrot.slane %v1037_v41, 2 }
 0x350   : > { %v1055_v9 = vadd.f32 %v1054_v40, %v1035_v3  ;;  %v1050_v52 = vrot.slane %v1049_v45, 2 }
 0x351   : > { %1529 = vmatmul.mubr.msk.f32.gmra.mrb[6].mxu0 %vm1076_vm10, %v1073_v60  ;;  %v1039_v22 = vadd.f32 %v1038_v51, %v1037_v41 }
 0x352   : > { %1533 = vmatmul.mubr.msk.f32.gmra.mrb[6].mxu1 %vm1076_vm10, %v1073_v60  ;;  %1165 = vmatprep.mubr.f32.mxu0 %v1878_v6  ;;  %v1056_v21 = vrot.slane %v1055_v9, 2  ;;  %v1051_v27 = vadd.f32 %v1050_v52, %v1049_v45 }
 0x353   : > { %1254 = vmatprep.mubr.f32.mxu1 %v1878_v6  ;;  %v1040_v28 = vrot.slane %v1039_v22, 1 }
 0x354   : > { %v1057_v35 = vadd.f32 %v1056_v21, %v1055_v9  ;;  %v1052_v58 = vrot.slane %v1051_v27, 1 }
 0x355   : > { %1530 = vmatmul.mubr.msk.f32.gmra.mrb[8].mxu0 %vm1076_vm10, %v1074_v61  ;;  %v1041_v44 = vadd.f32 %v1040_v28, %v1039_v22 }
 0x356   : > { %1534 = vmatmul.mubr.msk.f32.gmra.mrb[8].mxu1 %vm1076_vm10, %v1074_v61  ;;  %1171 = vmatprep.mubr.f32.mxu0 %v1878_v6  ;;  %v1058_v63 = vrot.slane %v1057_v35, 1  ;;  %v1053_v10 = vadd.f32 %v1052_v58, %v1051_v27 }
 0x357   : > { %1260 = vmatprep.mubr.f32.mxu1 %v1878_v6  ;;  %v1044_v6 = vrot.slane %v1043_v46, 2  ;;  %v1060_v14 = vadd.f32 900.0, %v1041_v44 }
 0x358   : > { %v1059_v13 = vadd.f32 %v1058_v63, %v1057_v35  ;;  %v1062_v15 = vadd.f32 900.0, %v1053_v10  ;;  %v1285_v35 = vpop.permute.xlu1 %1284 }
 0x359   : > { %1531 = vmatmul.mubr.msk.f32.gmra.mrb[10].mxu0 %vm1076_vm10, %v1075_v62  ;;  %v1045_v34 = vadd.f32 %v1044_v6, %v1043_v46  ;;  %1693 = vrcp.f32 %v1060_v14 }
 0x35a   : > { %1535 = vmatmul.mubr.msk.f32.gmra.mrb[10].mxu1 %vm1076_vm10, %v1075_v62  ;;  %v1063_v17 = vadd.f32 900.0, %v1059_v13  ;;  %1695 = vrcp.f32 %v1062_v15 }
 0x35b   : > { %v1046_v32 = vrot.slane %v1045_v34, 1 }
 0x35d   : > { %v1047_v11 = vadd.f32 %v1046_v32, %v1045_v34 }
 0x35f   : > { %v1061_v16 = vadd.f32 900.0, %v1047_v11 }
 0x361   : > { %1697 = vrcp.f32 %v1061_v16 }
 0x362   : > { %1699 = vrcp.f32 %v1063_v17 }
 0x363   : > { %v2367_v30 = vpop.eup %1693 }
 0x364   : > { %v2370_v36 = vpop.eup %1695 }
 0x36b   : > { %v2374_v47 = vpop.eup %1697 }
 0x36c   : > { %v1700_v54 = vpop.eup %1699 }
 0x420   : > { %v1155_v19 = vpop.f32.mrb[4].mxu0 }
 0x421   : > { %v1287_v23 = vadd.f32 %v1270_v18, %v1155_v19  ;;  %v1244_v24 = vpop.f32.mrb[4].mxu1  ;;  %v1157_v25 = vpop.f32.mrb[5].mxu0 }
 0x422   : > { %v1289_v26 = vadd.f32 %v1270_v18, %v1244_v24  ;;  %v1288_v29 = vadd.f32 %v1270_v18, %v1157_v25  ;;  %v1246_v12 = vpop.f32.mrb[5].mxu1 }
 0x423   : > { %v1305_v31 = vmul.f32 %v2365_v20, %v1287_v23  ;;  %v1290_v33 = vadd.f32 %v1270_v18, %v1246_v12 }
 0x424   : > { %v1307_v38 = vmul.f32 %v2365_v20, %v1289_v26  ;;  %v1306_v39 = vmul.f32 %v2365_v20, %v1288_v29  ;;  %v1161_v43 = vpop.f32.mrb[6].mxu0 }
 0x425   : > { %v1321_v48 = vmul.f32 %v2367_v30, %v1305_v31  ;;  %v1308_v37 = vmul.f32 %v2365_v20, %v1290_v33  ;;  %v1291_v49 = vadd.f32 %v1275_v42, %v1161_v43  ;;  %v1250_v50 = vpop.f32.mrb[6].mxu1  ;;  %v1163_v53 = vpop.f32.mrb[7].mxu0 }
 0x426   : > { %v1323_v55 = vmul.f32 %v2370_v36, %v1307_v38  ;;  %v1322_v56 = vmul.f32 %v2374_v47, %v1306_v39  ;;  %v1293_v57 = vadd.f32 %v1275_v42, %v1250_v50  ;;  %v1292_v59 = vadd.f32 %v1275_v42, %v1163_v53  ;;  %v1252_v60 = vpop.f32.mrb[7].mxu1 }
 0x427   : > { %1337 = vst [vmem:[%s2114_s19] sm:$0xff] %v1321_v48  ;;  %v1324_v61 = vmul.f32 %v1700_v54, %v1308_v37  ;;  %v1309_v62 = vmul.f32 %v2365_v20, %v1291_v49  ;;  %v1294_v8 = vadd.f32 %v1275_v42, %v1252_v60 }
 0x428   : > { %1339 = vst [vmem:[%s2114_s19 + $0x10] sm:$0xff] %v1323_v55  ;;  %1338 = vst [vmem:[%s2114_s19 + $0x8] sm:$0xff] %v1322_v56  ;;  %v1311_v1 = vmul.f32 %v2365_v20, %v1293_v57  ;;  %v1310_v2 = vmul.f32 %v2365_v20, %v1292_v59  ;;  %v1167_v3 = vpop.f32.mrb[8].mxu0 }
 0x429   : > { %1340 = vst [vmem:[%s2114_s19 + $0x18] sm:$0xff] %v1324_v61  ;;  %v1325_v4 = vmul.f32 %v2367_v30, %v1309_v62  ;;  %v1312_v5 = vmul.f32 %v2365_v20, %v1294_v8  ;;  %v1295_v7 = vadd.f32 %v1280_v0, %v1167_v3  ;;  %v1256_v40 = vpop.f32.mrb[8].mxu1  ;;  %v1169_v41 = vpop.f32.mrb[9].mxu0 }
 0x42a   : > { %v1327_v45 = vmul.f32 %v2370_v36, %v1311_v1  ;;  %v1326_v46 = vmul.f32 %v2374_v47, %v1310_v2  ;;  %v1297_v9 = vadd.f32 %v1280_v0, %v1256_v40  ;;  %v1296_v51 = vadd.f32 %v1280_v0, %v1169_v41  ;;  %v1258_v52 = vpop.f32.mrb[9].mxu1 }
 0x42b   : > { %1341 = vst [vmem:[%s2114_s19 + $0x20] sm:$0xff] %v1325_v4  ;;  %v1328_v6 = vmul.f32 %v1700_v54, %v1312_v5  ;;  %v1313_v21 = vmul.f32 %v2365_v20, %v1295_v7  ;;  %v1298_v22 = vadd.f32 %v1280_v0, %v1258_v52 }
 0x42c   : > { %1343 = vst [vmem:[%s2114_s19 + $0x30] sm:$0xff] %v1327_v45  ;;  %1342 = vst [vmem:[%s2114_s19 + $0x28] sm:$0xff] %v1326_v46  ;;  %v1315_v27 = vmul.f32 %v2365_v20, %v1297_v9  ;;  %v1314_v34 = vmul.f32 %v2365_v20, %v1296_v51  ;;  %v1173_v28 = vpop.f32.mrb[10].mxu0 }
 0x42d   : > { %1344 = vst [vmem:[%s2114_s19 + $0x38] sm:$0xff] %v1328_v6  ;;  %v1329_v58 = vmul.f32 %v2367_v30, %v1313_v21  ;;  %v1316_v32 = vmul.f32 %v2365_v20, %v1298_v22  ;;  %v1299_v63 = vadd.f32 %v1285_v35, %v1173_v28  ;;  %v1262_v44 = vpop.f32.mrb[10].mxu1  ;;  %v1175_v10 = vpop.f32.mrb[11].mxu0 }
 0x42e   : > { %v1331_v11 = vmul.f32 %v2370_v36, %v1315_v27  ;;  %v1330_v13 = vmul.f32 %v2374_v47, %v1314_v34  ;;  %v1301_v14 = vadd.f32 %v1285_v35, %v1262_v44  ;;  %v1300_v15 = vadd.f32 %v1285_v35, %v1175_v10  ;;  %v1264_v16 = vpop.f32.mrb[11].mxu1 }
 0x42f   : > { %1345 = vst [vmem:[%s2114_s19 + $0x40] sm:$0xff] %v1329_v58  ;;  %v1332_v17 = vmul.f32 %v1700_v54, %v1316_v32  ;;  %v1317_v18 = vmul.f32 %v2365_v20, %v1299_v63  ;;  %v1302_v19 = vadd.f32 %v1285_v35, %v1264_v16 }
 0x430   : > { %1347 = vst [vmem:[%s2114_s19 + $0x50] sm:$0xff] %v1331_v11  ;;  %1346 = vst [vmem:[%s2114_s19 + $0x48] sm:$0xff] %v1330_v13  ;;  %v1319_v23 = vmul.f32 %v2365_v20, %v1301_v14  ;;  %v1318_v24 = vmul.f32 %v2365_v20, %v1300_v15 }
 0x431   : > { %1348 = vst [vmem:[%s2114_s19 + $0x58] sm:$0xff] %v1332_v17  ;;  %v1333_v25 = vmul.f32 %v2367_v30, %v1317_v18  ;;  %v1320_v26 = vmul.f32 %v2365_v20, %v1302_v19 }
 0x432   : > { %v1335_v29 = vmul.f32 %v2370_v36, %v1319_v23  ;;  %v1334_v12 = vmul.f32 %v2374_v47, %v1318_v24 }
 0x433   : > { %1349 = vst [vmem:[%s2114_s19 + $0x60] sm:$0xff] %v1333_v25  ;;  %v1336_v31 = vmul.f32 %v1700_v54, %v1320_v26 }
 0x434   : > { %1351 = vst [vmem:[%s2114_s19 + $0x70] sm:$0xff] %v1335_v29  ;;  %1350 = vst [vmem:[%s2114_s19 + $0x68] sm:$0xff] %v1334_v12 }
 0x435   : > { %1352 = vst [vmem:[%s2114_s19 + $0x78] sm:$0xff] %v1336_v31 }
 0x436 PF: > { %s2535_s13 = sld [smem:[#allocation13_spill]]  ;;  %s1361_s28 = smul.u32 %s1845_s29, %s1849_s30 }
 0x437   : > { %s1370_s6 = sshll.u32 %s2114_s19, 4  ;;  %s2536_s17 = sld [smem:[#allocation20_spill]]  ;;  %s2421_s6 = int_to_ptr.vmem [resolvable:$true] %s1370_s6 }
 0x438   : > { %s1537_s8 = sshll.u32 %s1361_s28, 2  ;;  %s2430_s12 = scalar_lea.sflag [#allocation8], %s295_s22 }
 0x439   : > { %s1731_s0 = scalar_lea.vmem %s2421_s6, 2048  ;;  %p2537_p1 = scmp.ne.s32.totalorder %s2527_s14, 0 }
 0x43a   : > { %p1732_p4 = scmp.ne.s32.totalorder %s2421_s6, %s1731_s0  ;;  %s1879_s29 = smov [#allocation9]  }
 0x43b   : > { %s1735_s30 = sshll.u32 %s1879_s29, 4  ;;  %s1736_s30 = int_to_ptr.vmem [resolvable:$false] %s1735_s30 }
 0x43c   : > { %s1538_s26 = sshll.u32 %s2535_s13, 5  ;;  %p1733_p3 = pnand %p1732_p4, %p2537_p1 }
 0x43d   : > { %s1367_s5 = sadd.s32 %s1538_s26, %s1537_s8  ;;  %s1737_s19 = scalar_lea.vmem %s1736_s30, 4096 }
 0x43e   : > { %s1539_s15 = sshll.u32 %s1367_s5, 7  ;;  %p1734_p8 = pneg %p1733_p3 }
 0x43f   : > { %s2426_s21 = scalar_lea.hbm %s2536_s17, %s1539_s15  ;;  %p1738_p9 = scmp.lt.s32.totalorder %s2421_s6, %s1736_s30 }
 0x440   : > { %p1739_p11 = scmp.lt.s32.totalorder %s1737_s19, %s1731_s0 }
 0x442   : > { %p1740_p12 = por %p1739_p11, %p1738_p9 }
 0x444   : > { %p1741_p13 = pnand %p1740_p12, %p1734_p8 }
 0x446   : > { %1744 = shalt.err (!%p1741_p13)
}
 0x447   : > { %s1745_s22 = scalar_lea.hbm %s2426_s21, 2048  ;;  %s1749_s26 = scalar_lea.hbm %s2536_s17, 8192 }
 0x448   : > { %p1746_p6 = scmp.ne.s32.totalorder %s2426_s21, %s1745_s22  ;;  %p1750_p7 = scmp.lt.u32.totalorder %s2426_s21, %s2536_s17 }
 0x449   : > { %p1751_p0 = scmp.lt.u32.totalorder %s1749_s26, %s1745_s22  ;;  %p1753_p4 = scmp.lt.u32.totalorder %s1745_s22, %s2426_s21 }
 0x44a   : > { %p1747_p5 = pnand %p1746_p6, %p2537_p1 }
 0x44b   : > { %p1752_p2 = por %p1751_p0, %p1750_p7 }
 0x44c   : > { %p1748_p10 = pneg %p1747_p5 }
 0x44d   : > { %p1754_p3 = por %p1753_p4, %p1752_p2 }
 0x44f   : > { %p1755_p8 = pnand %p1754_p3, %p1748_p10 }
 0x451   : > { %1758 = shalt.err (!%p1755_p8)
}
 0x452   : > { %s1880_s0 = smov 512   ;;  %s1881_s15 = smov 1024  }
 0x453   : > { %s1882_s18 = smov 32  }
 0x454   : > { %1544 = dma.vmem_to_hbm [thread:$0]  (%p2537_p1), %s2421_s6, 2048, %s2426_s21, %s2430_s12, %s1880_s0, %s1881_s15, %s1882_s18  }
 0x455 PF: > { %p1555_p9 = scmp.ge.s32.totalorder %s1869_s10, 2  ;;  %s1385_s16 = sand.u32 1, %s1821_s23  }
 0x456   : > { %p2538_p11 = scmp.ne.s32.totalorder %s2531_s11, 0  ;;  %s1386_s29 = scalar_lea.sflag [#allocation8], %s1385_s16 }
 0x458   : > { %p1551_p12 = pnand %p1555_p9, %p2538_p11 }
 0x45a   : > { %1816 = dma.done.wait (!%p1551_p12), %s1386_s29, 2048  }
 0x45b   : > { %1818 = vsyncadd (!%p1551_p12), %s1386_s29, 4294965248  ;;  %s23_s10 = sadd.s32 1, %s1869_s10   ;;  %s2540_s14 = sld [smem:[#allocation12_spill]] }
 0x45c   : > { %p2459_p13 = scmp.ge.s32.totalorder %s23_s10, 10   ;;  %s2541_s28 = sld [smem:[#allocation18_spill]] }
 0x45d   : > { %s2542_s6 = sld [smem:[#allocation14_spill]]  ;;  %s2543_s11 = sld [smem:[#allocation15_spill]] }
 0x45e   : > { %s2544_s8 = sld [smem:[#allocation16_spill]]  ;;  %s2545_s21 = sld [smem:[#allocation17_spill]] }
 0x45f   : > { %s2547_s23 = smov %s1825_s24  ;;  %s2548_s24 = smov %s1829_s25 }
 0x460   : > { %s2549_s25 = smov %s2035_s20  ;;  %s2550_s26 = smov %s1837_s27 }
 0x461   : > { %s2551_s27 = smov %s2540_s14  ;;  %s2552_s29 = smov %s1857_s7 }
 0x462   : > { %s2554_s5 = smov %s1865_s9  ;;  %22 = sbr.rel (!%p2459_p13) target bundleno = 14 (0xe), region = 101 }
 0x463   : > { %s2553_s30 = smov %s2542_s6  ;;  %s2555_s7 = smov %s2543_s11 }
 0x464   : > { %s2556_s9 = smov %s2545_s21 }
 0x469   :  { %1391 = vsyncpa [#allocation7], 1 }
 0x46a   :  { %1393 = vsyncpa [#allocation7 + $0x1], 1 }
 0x46b   :  { %1394 = vsyncpa [#allocation8], 1 }
 0x46c   :  { %1396 = vsyncpa [#allocation8 + $0x1], 1 }

</bundles_post_ra>
